<compile_context>
chip_gen: v5e
topology: v5e:2x2
jax: 0.10.0
libtpu: 0.0.40
codegen_flags: <defaults>
</compile_context>

<pallas_src>
import jax
import jax.numpy as jnp
from jax.experimental import pallas as pl
from jax.experimental.pallas import tpu as pltpu

IN_CHANNELS = 1
HIDDEN = 64
NUM_LAYERS = 5
NUM_CLASSES = 2
OUT_PAD = 128          # lane-dense padding of the class dim
BN_EPS = 1e-5
GIN_EPS = 0.0          # GINConv eps (train_eps=False default)


def _round_up(v, m):
    return (v + m - 1) // m * m


# ----------------------------------------------------------------------------
# Fused kernel.  Grid = (layer l, row tile m, contraction tile k).
#   h_odd_ref  : seeded with padded x; input of even layers, output of odd.
#   h_even_ref : output of even layers, input of odd layers.
# ----------------------------------------------------------------------------
def _fused_gnn_kernel(x_ref, a_ref, s_ref,
                      w1_ref, b1_ref, w2_ref, b2_ref,
                      wout_ref, wx_ref, lb_ref,
                      o_ref,
                      acc_ref, h_even_ref, h_odd_ref):
    l = pl.program_id(0)
    m = pl.program_id(1)
    k = pl.program_id(2)
    nk = pl.num_programs(2)
    tile = a_ref.shape[0]
    l_is_even = (l % 2) == 0

    # one-time init: seed layer-0 input, start the output accumulator at bias
    @pl.when((l == 0) & (m == 0) & (k == 0))
    def _init():
        h_odd_ref[...] = x_ref[...]
        o_ref[...] = jnp.broadcast_to(lb_ref[...], o_ref.shape)

    # reduction over k:  acc += A[m, k] @ h_prev[k]
    @pl.when(k == 0)
    def _zero_acc():
        acc_ref[...] = jnp.zeros_like(acc_ref)

    col = pl.multiple_of(k * tile, tile)
    h_in = jnp.where(l_is_even,
                     h_odd_ref[pl.ds(col, tile), :],
                     h_even_ref[pl.ds(col, tile), :])
    acc_ref[...] += jnp.dot(a_ref[...], h_in.astype(jnp.bfloat16),
                            preferred_element_type=jnp.float32)

    # epilogue at the last k tile: GIN MLP + folded-BN + ReLU, write the new
    # activations back to the other ping-pong buffer, and accumulate the
    # jk='cat' sum-pool readout straight into the final linear output.
    @pl.when(k == nk - 1)
    def _epilogue():
        row = pl.multiple_of(m * tile, tile)
        h_self = jnp.where(l_is_even,
                           h_odd_ref[pl.ds(row, tile), :],
                           h_even_ref[pl.ds(row, tile), :])
        agg = acc_ref[...] + (1.0 + GIN_EPS) * h_self

        z = jnp.dot(agg, w1_ref[0], preferred_element_type=jnp.float32) + b1_ref[0]
        z = jnp.maximum(z, 0.0)
        h_new = jnp.dot(z, w2_ref[0], preferred_element_type=jnp.float32) + b2_ref[0]
        h_new = jnp.maximum(h_new, 0.0)          # BN folded into W2'/b2', then ReLU

        @pl.when(l_is_even)
        def _():
            h_even_ref[pl.ds(row, tile), :] = h_new

        @pl.when(jnp.logical_not(l_is_even))
        def _():
            h_odd_ref[pl.ds(row, tile), :] = h_new

        # out += (S[:, rows] @ h_new) @ W_layer_l   (per-layer slice of Linear)
        s_tile = s_ref[...].astype(jnp.float32)                     # [Gp, tile]
        pooled = jnp.dot(s_tile, h_new, preferred_element_type=jnp.float32)
        o_ref[...] += jnp.dot(pooled, wout_ref[0],
                              preferred_element_type=jnp.float32)

        # first_graph_descriptor = scatter_add(x): at layer 0, h_self holds the
        # (64-padded) input x, so pool it through the x column of the Linear.
        @pl.when(l == 0)
        def _():
            px = jnp.dot(s_tile, h_self, preferred_element_type=jnp.float32)
            o_ref[...] += jnp.dot(px, wx_ref[...],
                                  preferred_element_type=jnp.float32)


def _fused_gnn(x_pad, a_pad, s_pad, w1s, b1s, w2s, b2s, wouts, wx, lb, *, tile):
    np_ = a_pad.shape[0]
    gp = s_pad.shape[0]
    nl = w1s.shape[0]
    mt = np_ // tile
    kt = np_ // tile

    # scoped-VMEM sizing: double-buffered A/S tiles + resident x + ping-pong
    # activations + accumulator + weight stacks (+ headroom), capped for v7x.
    est = (2 * tile * tile * 2 + 2 * gp * tile * 2
           + 2 * np_ * HIDDEN * 4 + 2 * np_ * HIDDEN * 4
           + tile * HIDDEN * 4
           + 4 * nl * (2 * HIDDEN * HIDDEN + 2 * HIDDEN + HIDDEN * OUT_PAD)
           + 4 * (HIDDEN * OUT_PAD + OUT_PAD + 2 * gp * OUT_PAD))
    vmem_limit = int(min(48 * 2 ** 20, max(16 * 2 ** 20, 2 * est)))

    return pl.pallas_call(
        _fused_gnn_kernel,
        out_shape=jax.ShapeDtypeStruct((gp, OUT_PAD), jnp.float32),
        grid_spec=pltpu.PrefetchScalarGridSpec(
            num_scalar_prefetch=0,
            grid=(nl, mt, kt),
            in_specs=[
                pl.BlockSpec((np_, HIDDEN), lambda l, m, k: (0, 0)),           # x (padded, resident)
                pl.BlockSpec((tile, tile), lambda l, m, k: (m, k)),            # A tile (streamed, bf16)
                pl.BlockSpec((gp, tile), lambda l, m, k: (0, m)),              # S column tile (bf16)
                pl.BlockSpec((1, HIDDEN, HIDDEN), lambda l, m, k: (l, 0, 0)),  # W1[l]
                pl.BlockSpec((1, 1, HIDDEN), lambda l, m, k: (l, 0, 0)),       # b1[l]
                pl.BlockSpec((1, HIDDEN, HIDDEN), lambda l, m, k: (l, 0, 0)),  # W2'[l] (BN folded)
                pl.BlockSpec((1, 1, HIDDEN), lambda l, m, k: (l, 0, 0)),       # b2'[l] (BN folded)
                pl.BlockSpec((1, HIDDEN, OUT_PAD), lambda l, m, k: (l, 0, 0)), # Linear slice for layer l
                pl.BlockSpec((HIDDEN, OUT_PAD), lambda l, m, k: (0, 0)),       # Linear slice for x
                pl.BlockSpec((1, OUT_PAD), lambda l, m, k: (0, 0)),            # Linear bias
            ],
            out_specs=pl.BlockSpec((gp, OUT_PAD), lambda l, m, k: (0, 0)),
            scratch_shapes=[
                pltpu.VMEM((tile, HIDDEN), jnp.float32),   # A@h accumulator
                pltpu.VMEM((np_, HIDDEN), jnp.float32),    # h written by even layers
                pltpu.VMEM((np_, HIDDEN), jnp.float32),    # h written by odd layers (seeded w/ x)
            ]),
        compiler_params=pltpu.CompilerParams(
            dimension_semantics=("arbitrary", "arbitrary", "arbitrary"),
            vmem_limit_bytes=vmem_limit),
    )(x_pad, a_pad, s_pad, w1s, b1s, w2s, b2s, wouts, wx, lb)


# ----------------------------------------------------------------------------
# Host-side parameter folding / packing (eval-mode BN folded into W2/b2)
# ----------------------------------------------------------------------------
def _fold_and_stack_params(params):
    w1s, b1s, w2s, b2s = [], [], [], []
    for (w1, b1, w2, b2, gamma, beta, mean, var) in params['gin_layers']:
        c_in = w1.shape[0]
        w1p = jnp.zeros((HIDDEN, HIDDEN), jnp.float32).at[:c_in, :].set(w1)
        scale = gamma * jax.lax.rsqrt(var + BN_EPS)          # [1, H]
        w1s.append(w1p)
        b1s.append(b1)
        w2s.append(w2 * scale)                               # scale output cols
        b2s.append((b2 - mean) * scale + beta)
    lw, lb = params['lin_w'], params['lin_b']                # [1+H*L, C], [1, C]
    c = lw.shape[1]
    wx = jnp.zeros((HIDDEN, OUT_PAD), jnp.float32).at[0, :c].set(lw[0])
    wouts = jnp.zeros((NUM_LAYERS, HIDDEN, OUT_PAD), jnp.float32)
    for l in range(NUM_LAYERS):
        wouts = wouts.at[l, :, :c].set(lw[1 + HIDDEN * l: 1 + HIDDEN * (l + 1)])
    lbp = jnp.zeros((1, OUT_PAD), jnp.float32).at[0, :c].set(lb[0])
    return (jnp.stack(w1s), jnp.stack(b1s), jnp.stack(w2s), jnp.stack(b2s),
            wouts, wx, lbp)


# ----------------------------------------------------------------------------
# Full forward
# ----------------------------------------------------------------------------
@jax.jit
def mygnn_forward(x, a, s, params):
    n, c_in = x.shape
    g = s.shape[0]
    tile = max(128, min(512, _round_up(n, 128)))
    np_ = _round_up(n, tile)
    gp = _round_up(g, 16)

    x_pad = jnp.zeros((np_, HIDDEN), jnp.float32).at[:n, :c_in].set(x)
    a_pad = jnp.zeros((np_, np_), jnp.bfloat16).at[:n, :n].set(a.astype(jnp.bfloat16))
    s_pad = jnp.zeros((gp, np_), jnp.bfloat16).at[:g, :n].set(s.astype(jnp.bfloat16))

    w1s, b1s, w2s, b2s, wouts, wx, lbp = _fold_and_stack_params(params)
    out_pad = _fused_gnn(x_pad, a_pad, s_pad, w1s, b1s, w2s, b2s, wouts, wx, lbp,
                         tile=tile)
    # final_dropout: identity (eval mode)
    return out_pad[:g, :NUM_CLASSES]


# ----------------------------------------------------------------------------
# Parameter init (deterministic, synthetic — shapes match the PyTorch module)
# ----------------------------------------------------------------------------
def init_params(key):
    params = {'gin_layers': []}
    c_in = IN_CHANNELS
    for _ in range(NUM_LAYERS):
        key, k1, k2, k3, k4 = jax.random.split(key, 5)
        w1 = jax.random.normal(k1, (c_in, HIDDEN), jnp.float32) / jnp.sqrt(
            jnp.float32(c_in))
        b1 = 0.01 * jax.random.normal(k2, (1, HIDDEN), jnp.float32)
        w2 = jax.random.normal(k3, (HIDDEN, HIDDEN), jnp.float32) / jnp.sqrt(
            jnp.float32(HIDDEN))
        b2 = 0.01 * jax.random.normal(k4, (1, HIDDEN), jnp.float32)
        gamma = jnp.ones((1, HIDDEN), jnp.float32)
        beta = jnp.zeros((1, HIDDEN), jnp.float32)
        mean = jnp.zeros((1, HIDDEN), jnp.float32)
        var = jnp.ones((1, HIDDEN), jnp.float32)
        params['gin_layers'].append((w1, b1, w2, b2, gamma, beta, mean, var))
        c_in = HIDDEN
    d = IN_CHANNELS + HIDDEN * NUM_LAYERS  # 1 + 320 = 321
    key, kw = jax.random.split(key)
    params['lin_w'] = jax.random.normal(kw, (d, NUM_CLASSES), jnp.float32) / jnp.sqrt(
        jnp.float32(d))
    params['lin_b'] = jnp.zeros((1, NUM_CLASSES), jnp.float32)
    return params


if __name__ == "__main__":
    key = jax.random.PRNGKey(0)

    # Small synthetic graph batch: 2 graphs x 8 nodes = 16 nodes.
    N, G = 16, 2
    nodes_per_graph = N // G

    k_x, k_p = jax.random.split(key)
    x = jax.random.normal(k_x, (N, IN_CHANNELS), jnp.float32)   # data.x

    # Ring edges within each graph (both directions) -> edge_index [2, E].
    srcs, dsts = [], []
    for g in range(G):
        base = g * nodes_per_graph
        for i in range(nodes_per_graph):
            u = base + i
            v = base + (i + 1) % nodes_per_graph
            srcs += [u, v]
            dsts += [v, u]
    edge_index = jnp.array([srcs, dsts], dtype=jnp.int32)       # data.edge_index
    batch = jnp.repeat(jnp.arange(G, dtype=jnp.int32), nodes_per_graph)  # data.batch

    # Dense operators for the kernel: adjacency (sum agg) + graph one-hot.
    a = jnp.zeros((N, N), jnp.float32).at[edge_index[1], edge_index[0]].add(1.0)
    s = jax.nn.one_hot(batch, G, dtype=jnp.float32).T            # [G, N]

    params = init_params(k_p)

    out = mygnn_forward(x, a, s, params)
    jax.block_until_ready(out)
    assert out.shape == (G, NUM_CLASSES)
    print("KERNEL_OK")
</pallas_src>

<mosaic_0001>
module attributes {stable_mosaic.version = 11 : i64} {
  func.func @_fused_gnn_kernel(%arg0: i32, %arg1: i32, %arg2: i32, %arg3: memref<128x64xf32, #tpu.memory_space<vmem>>, %arg4: memref<128x128xbf16, #tpu.memory_space<vmem>>, %arg5: memref<16x128xbf16, #tpu.memory_space<vmem>>, %arg6: memref<1x64x64xf32, #tpu.memory_space<vmem>>, %arg7: memref<1x1x64xf32, #tpu.memory_space<vmem>>, %arg8: memref<1x64x64xf32, #tpu.memory_space<vmem>>, %arg9: memref<1x1x64xf32, #tpu.memory_space<vmem>>, %arg10: memref<1x64x128xf32, #tpu.memory_space<vmem>>, %arg11: memref<64x128xf32, #tpu.memory_space<vmem>>, %arg12: memref<1x128xf32, #tpu.memory_space<vmem>>, %arg13: memref<16x128xf32, #tpu.memory_space<vmem>>, %arg14: memref<128x64xf32, #tpu.memory_space<vmem>>, %arg15: memref<128x64xf32, #tpu.memory_space<vmem>>, %arg16: memref<128x64xf32, #tpu.memory_space<vmem>>) attributes {dimension_semantics = [#tpu.dimension_semantics<arbitrary>, #tpu.dimension_semantics<arbitrary>, #tpu.dimension_semantics<arbitrary>], iteration_bounds = array<i64: 5, 1, 1>, scalar_prefetch = 0 : i64, scratch_operands = 3 : i64, tpu.core_type = #tpu.core_type<tc>, window_params = [{pipeline_mode = #tpu.pipeline_mode<synchronous>, transform_indices = @transform_0, window_bounds = array<i64: 128, 64>}, {transform_indices = @transform_1, window_bounds = array<i64: 128, 128>}, {transform_indices = @transform_2, window_bounds = array<i64: 16, 128>}, {transform_indices = @transform_3, window_bounds = array<i64: 1, 64, 64>}, {transform_indices = @transform_4, window_bounds = array<i64: 1, 1, 64>}, {transform_indices = @transform_5, window_bounds = array<i64: 1, 64, 64>}, {transform_indices = @transform_6, window_bounds = array<i64: 1, 1, 64>}, {transform_indices = @transform_7, window_bounds = array<i64: 1, 64, 128>}, {pipeline_mode = #tpu.pipeline_mode<synchronous>, transform_indices = @transform_8, window_bounds = array<i64: 64, 128>}, {pipeline_mode = #tpu.pipeline_mode<synchronous>, transform_indices = @transform_9, window_bounds = array<i64: 1, 128>}, {pipeline_mode = #tpu.pipeline_mode<synchronous>, transform_indices = @transform_10, window_bounds = array<i64: 16, 128>}]} {
    %c2_i32 = arith.constant 2 : i32
    %c0_i32 = arith.constant 0 : i32
    %0 = arith.cmpi eq, %c2_i32, %c0_i32 : i32
    %c1_i32 = arith.constant 1 : i32
    %1 = arith.select %0, %c1_i32, %c2_i32 : i32
    %2 = arith.remsi %arg0, %1 : i32
    %c0_i32_0 = arith.constant 0 : i32
    %3 = arith.cmpi ne, %2, %c0_i32_0 : i32
    %c0_i32_1 = arith.constant 0 : i32
    %4 = arith.cmpi slt, %2, %c0_i32_1 : i32
    %c0_i32_2 = arith.constant 0 : i32
    %5 = arith.cmpi slt, %1, %c0_i32_2 : i32
    %6 = arith.xori %4, %5 : i1
    %7 = arith.andi %6, %3 : i1
    %8 = arith.addi %2, %1 : i32
    %9 = arith.select %7, %8, %2 : i32
    %c0_i32_3 = arith.constant 0 : i32
    %10 = arith.cmpi eq, %9, %c0_i32_3 : i32
    %c0_i32_4 = arith.constant 0 : i32
    %11 = arith.cmpi eq, %arg0, %c0_i32_4 : i32
    %c0_i32_5 = arith.constant 0 : i32
    %12 = arith.cmpi eq, %arg1, %c0_i32_5 : i32
    %13 = arith.andi %11, %12 : i1
    %c0_i32_6 = arith.constant 0 : i32
    %14 = arith.cmpi eq, %arg2, %c0_i32_6 : i32
    %15 = arith.andi %13, %14 : i1
    %16 = arith.extui %15 : i1 to i32
    %c0_i32_7 = arith.constant 0 : i32
    %17 = arith.cmpi ne, %16, %c0_i32_7 : i32
    scf.if %17 {
      %c0_19 = arith.constant 0 : index
      %c0_20 = arith.constant 0 : index
      %37 = vector.load %arg3[%c0_19, %c0_20] : memref<128x64xf32, #tpu.memory_space<vmem>>, vector<128x64xf32>
      %c0_21 = arith.constant 0 : index
      %c0_22 = arith.constant 0 : index
      %38 = vector.load %arg16[%c0_21, %c0_22] : memref<128x64xf32, #tpu.memory_space<vmem>>, vector<128x64xf32>
      tpu.vector_store %arg16[%c0_21, %c0_22], %37 {strides = array<i32>} : memref<128x64xf32, #tpu.memory_space<vmem>>, vector<128x64xf32>,
      %c0_23 = arith.constant 0 : index
      %c0_24 = arith.constant 0 : index
      %39 = vector.load %arg12[%c0_23, %c0_24] : memref<1x128xf32, #tpu.memory_space<vmem>>, vector<1x128xf32>
      %40 = vector.shape_cast %39 : vector<1x128xf32> to vector<1x128xf32>
      %41 = vector.broadcast %40 : vector<1x128xf32> to vector<16x128xf32>
      %c0_25 = arith.constant 0 : index
      %c0_26 = arith.constant 0 : index
      %42 = vector.load %arg13[%c0_25, %c0_26] : memref<16x128xf32, #tpu.memory_space<vmem>>, vector<16x128xf32>
      tpu.vector_store %arg13[%c0_25, %c0_26], %41 {strides = array<i32>} : memref<16x128xf32, #tpu.memory_space<vmem>>, vector<16x128xf32>,
    } else {
    }
    %c0_i32_8 = arith.constant 0 : i32
    %18 = arith.cmpi eq, %arg2, %c0_i32_8 : i32
    %19 = arith.extui %18 : i1 to i32
    %c0_i32_9 = arith.constant 0 : i32
    %20 = arith.cmpi ne, %19, %c0_i32_9 : i32
    scf.if %20 {
      %cst_19 = arith.constant 0.000000e+00 : f32
      %37 = vector.broadcast %cst_19 : f32 to vector<128x64xf32>
      %c0_20 = arith.constant 0 : index
      %c0_21 = arith.constant 0 : index
      %38 = vector.load %arg14[%c0_20, %c0_21] : memref<128x64xf32, #tpu.memory_space<vmem>>, vector<128x64xf32>
      tpu.vector_store %arg14[%c0_20, %c0_21], %37 {strides = array<i32>} : memref<128x64xf32, #tpu.memory_space<vmem>>, vector<128x64xf32>,
    } else {
    }
    %c128_i32 = arith.constant 128 : i32
    %21 = arith.muli %arg2, %c128_i32 : i32
    %22 = tpu.assume_multiple %21, 128 : i32
    %23 = arith.index_cast %22 : i32 to index
    %c0 = arith.constant 0 : index
    %24 = vector.load %arg16[%23, %c0] : memref<128x64xf32, #tpu.memory_space<vmem>>, vector<128x64xf32>
    %25 = arith.index_cast %22 : i32 to index
    %c0_10 = arith.constant 0 : index
    %26 = vector.load %arg15[%25, %c0_10] : memref<128x64xf32, #tpu.memory_space<vmem>>, vector<128x64xf32>
    %27 = arith.select %10, %24, %26 : vector<128x64xf32>
    %c0_11 = arith.constant 0 : index
    %c0_12 = arith.constant 0 : index
    %28 = vector.load %arg14[%c0_11, %c0_12] : memref<128x64xf32, #tpu.memory_space<vmem>>, vector<128x64xf32>
    %c0_13 = arith.constant 0 : index
    %c0_14 = arith.constant 0 : index
    %29 = vector.load %arg4[%c0_13, %c0_14] : memref<128x128xbf16, #tpu.memory_space<vmem>>, vector<128x128xbf16>
    %30 = arith.truncf %27 : vector<128x64xf32> to vector<128x64xbf16>
    %cst = arith.constant dense<0.000000e+00> : vector<128x64xf32>
    %31 = tpu.matmul %29, %30, %cst {dimension_numbers = #tpu.dot_dimension_numbers<[1], [0], [0], [1], [0, 0, 1, 1], [], []>} : vector<128x128xbf16>, vector<128x64xbf16>, vector<128x64xf32> -> vector<128x64xf32>
    %32 = arith.addf %28, %31 : vector<128x64xf32>
    %c0_15 = arith.constant 0 : index
    %c0_16 = arith.constant 0 : index
    %33 = vector.load %arg14[%c0_15, %c0_16] : memref<128x64xf32, #tpu.memory_space<vmem>>, vector<128x64xf32>
    tpu.vector_store %arg14[%c0_15, %c0_16], %32 {strides = array<i32>} : memref<128x64xf32, #tpu.memory_space<vmem>>, vector<128x64xf32>,
    %c0_i32_17 = arith.constant 0 : i32
    %34 = arith.cmpi eq, %arg2, %c0_i32_17 : i32
    %35 = arith.extui %34 : i1 to i32
    %c0_i32_18 = arith.constant 0 : i32
    %36 = arith.cmpi ne, %35, %c0_i32_18 : i32
    scf.if %36 {
      %c128_i32_19 = arith.constant 128 : i32
      %37 = arith.muli %arg1, %c128_i32_19 : i32
      %38 = tpu.assume_multiple %37, 128 : i32
      %39 = arith.index_cast %38 : i32 to index
      %c0_20 = arith.constant 0 : index
      %40 = vector.load %arg16[%39, %c0_20] : memref<128x64xf32, #tpu.memory_space<vmem>>, vector<128x64xf32>
      %41 = arith.index_cast %38 : i32 to index
      %c0_21 = arith.constant 0 : index
      %42 = vector.load %arg15[%41, %c0_21] : memref<128x64xf32, #tpu.memory_space<vmem>>, vector<128x64xf32>
      %43 = arith.select %10, %40, %42 : vector<128x64xf32>
      %c0_22 = arith.constant 0 : index
      %c0_23 = arith.constant 0 : index
      %44 = vector.load %arg14[%c0_22, %c0_23] : memref<128x64xf32, #tpu.memory_space<vmem>>, vector<128x64xf32>
      %cst_24 = arith.constant 1.000000e+00 : f32
      %45 = vector.broadcast %cst_24 : f32 to vector<128x64xf32>
      %46 = arith.mulf %45, %43 : vector<128x64xf32>
      %47 = arith.addf %44, %46 : vector<128x64xf32>
      %c0_25 = arith.constant 0 : index
      %c0_26 = arith.constant 0 : index
      %c0_27 = arith.constant 0 : index
      %48 = vector.load %arg6[%c0_25, %c0_26, %c0_27] : memref<1x64x64xf32, #tpu.memory_space<vmem>>, vector<1x64x64xf32>
      %49 = vector.shape_cast %48 : vector<1x64x64xf32> to vector<64x64xf32>
      %cst_28 = arith.constant dense<0.000000e+00> : vector<128x64xf32>
      %50 = tpu.matmul %47, %49, %cst_28 {dimension_numbers = #tpu.dot_dimension_numbers<[1], [0], [0], [1], [0, 0, 1, 1], [], []>} : vector<128x64xf32>, vector<64x64xf32>, vector<128x64xf32> -> vector<128x64xf32>
      %c0_29 = arith.constant 0 : index
      %c0_30 = arith.constant 0 : index
      %c0_31 = arith.constant 0 : index
      %51 = vector.load %arg7[%c0_29, %c0_30, %c0_31] : memref<1x1x64xf32, #tpu.memory_space<vmem>>, vector<1x1x64xf32>
      %52 = vector.shape_cast %51 : vector<1x1x64xf32> to vector<1x64xf32>
      %53 = vector.broadcast %52 : vector<1x64xf32> to vector<128x64xf32>
      %54 = arith.addf %50, %53 : vector<128x64xf32>
      %cst_32 = arith.constant 0.000000e+00 : f32
      %55 = vector.broadcast %cst_32 : f32 to vector<128x64xf32>
      %56 = arith.maximumf %54, %55 : vector<128x64xf32>
      %c0_33 = arith.constant 0 : index
      %c0_34 = arith.constant 0 : index
      %c0_35 = arith.constant 0 : index
      %57 = vector.load %arg8[%c0_33, %c0_34, %c0_35] : memref<1x64x64xf32, #tpu.memory_space<vmem>>, vector<1x64x64xf32>
      %58 = vector.shape_cast %57 : vector<1x64x64xf32> to vector<64x64xf32>
      %cst_36 = arith.constant dense<0.000000e+00> : vector<128x64xf32>
      %59 = tpu.matmul %56, %58, %cst_36 {dimension_numbers = #tpu.dot_dimension_numbers<[1], [0], [0], [1], [0, 0, 1, 1], [], []>} : vector<128x64xf32>, vector<64x64xf32>, vector<128x64xf32> -> vector<128x64xf32>
      %c0_37 = arith.constant 0 : index
      %c0_38 = arith.constant 0 : index
      %c0_39 = arith.constant 0 : index
      %60 = vector.load %arg9[%c0_37, %c0_38, %c0_39] : memref<1x1x64xf32, #tpu.memory_space<vmem>>, vector<1x1x64xf32>
      %61 = vector.shape_cast %60 : vector<1x1x64xf32> to vector<1x64xf32>
      %62 = vector.broadcast %61 : vector<1x64xf32> to vector<128x64xf32>
      %63 = arith.addf %59, %62 : vector<128x64xf32>
      %cst_40 = arith.constant 0.000000e+00 : f32
      %64 = vector.broadcast %cst_40 : f32 to vector<128x64xf32>
      %65 = arith.maximumf %63, %64 : vector<128x64xf32>
      %66 = arith.extui %10 : i1 to i32
      %c0_i32_41 = arith.constant 0 : i32
      %67 = arith.cmpi ne, %66, %c0_i32_41 : i32
      scf.if %67 {
        %83 = arith.index_cast %38 : i32 to index
        %c0_56 = arith.constant 0 : index
        %84 = vector.load %arg15[%83, %c0_56] : memref<128x64xf32, #tpu.memory_space<vmem>>, vector<128x64xf32>
        tpu.vector_store %arg15[%83, %c0_56], %65 {strides = array<i32>} : memref<128x64xf32, #tpu.memory_space<vmem>>, vector<128x64xf32>,
      } else {
      }
      %true = arith.constant true
      %68 = arith.xori %10, %true : i1
      %69 = arith.extui %68 : i1 to i32
      %c0_i32_42 = arith.constant 0 : i32
      %70 = arith.cmpi ne, %69, %c0_i32_42 : i32
      scf.if %70 {
        %83 = arith.index_cast %38 : i32 to index
        %c0_56 = arith.constant 0 : index
        %84 = vector.load %arg16[%83, %c0_56] : memref<128x64xf32, #tpu.memory_space<vmem>>, vector<128x64xf32>
        tpu.vector_store %arg16[%83, %c0_56], %65 {strides = array<i32>} : memref<128x64xf32, #tpu.memory_space<vmem>>, vector<128x64xf32>,
      } else {
      }
      %c0_43 = arith.constant 0 : index
      %c0_44 = arith.constant 0 : index
      %71 = vector.load %arg5[%c0_43, %c0_44] : memref<16x128xbf16, #tpu.memory_space<vmem>>, vector<16x128xbf16>
      %72 = arith.extf %71 : vector<16x128xbf16> to vector<16x128xf32>
      %cst_45 = arith.constant dense<0.000000e+00> : vector<16x64xf32>
      %73 = tpu.matmul %72, %65, %cst_45 {dimension_numbers = #tpu.dot_dimension_numbers<[1], [0], [0], [1], [0, 0, 1, 1], [], []>} : vector<16x128xf32>, vector<128x64xf32>, vector<16x64xf32> -> vector<16x64xf32>
      %c0_46 = arith.constant 0 : index
      %c0_47 = arith.constant 0 : index
      %74 = vector.load %arg13[%c0_46, %c0_47] : memref<16x128xf32, #tpu.memory_space<vmem>>, vector<16x128xf32>
      %c0_48 = arith.constant 0 : index
      %c0_49 = arith.constant 0 : index
      %c0_50 = arith.constant 0 : index
      %75 = vector.load %arg10[%c0_48, %c0_49, %c0_50] : memref<1x64x128xf32, #tpu.memory_space<vmem>>, vector<1x64x128xf32>
      %76 = vector.shape_cast %75 : vector<1x64x128xf32> to vector<64x128xf32>
      %cst_51 = arith.constant dense<0.000000e+00> : vector<16x128xf32>
      %77 = tpu.matmul %73, %76, %cst_51 {dimension_numbers = #tpu.dot_dimension_numbers<[1], [0], [0], [1], [0, 0, 1, 1], [], []>} : vector<16x64xf32>, vector<64x128xf32>, vector<16x128xf32> -> vector<16x128xf32>
      %78 = arith.addf %74, %77 : vector<16x128xf32>
      %c0_52 = arith.constant 0 : index
      %c0_53 = arith.constant 0 : index
      %79 = vector.load %arg13[%c0_52, %c0_53] : memref<16x128xf32, #tpu.memory_space<vmem>>, vector<16x128xf32>
      tpu.vector_store %arg13[%c0_52, %c0_53], %78 {strides = array<i32>} : memref<16x128xf32, #tpu.memory_space<vmem>>, vector<16x128xf32>,
      %c0_i32_54 = arith.constant 0 : i32
      %80 = arith.cmpi eq, %arg0, %c0_i32_54 : i32
      %81 = arith.extui %80 : i1 to i32
      %c0_i32_55 = arith.constant 0 : i32
      %82 = arith.cmpi ne, %81, %c0_i32_55 : i32
      scf.if %82 {
        %cst_56 = arith.constant dense<0.000000e+00> : vector<16x64xf32>
        %83 = tpu.matmul %72, %43, %cst_56 {dimension_numbers = #tpu.dot_dimension_numbers<[1], [0], [0], [1], [0, 0, 1, 1], [], []>} : vector<16x128xf32>, vector<128x64xf32>, vector<16x64xf32> -> vector<16x64xf32>
        %c0_57 = arith.constant 0 : index
        %c0_58 = arith.constant 0 : index
        %84 = vector.load %arg13[%c0_57, %c0_58] : memref<16x128xf32, #tpu.memory_space<vmem>>, vector<16x128xf32>
        %c0_59 = arith.constant 0 : index
        %c0_60 = arith.constant 0 : index
        %85 = vector.load %arg11[%c0_59, %c0_60] : memref<64x128xf32, #tpu.memory_space<vmem>>, vector<64x128xf32>
        %cst_61 = arith.constant dense<0.000000e+00> : vector<16x128xf32>
        %86 = tpu.matmul %83, %85, %cst_61 {dimension_numbers = #tpu.dot_dimension_numbers<[1], [0], [0], [1], [0, 0, 1, 1], [], []>} : vector<16x64xf32>, vector<64x128xf32>, vector<16x128xf32> -> vector<16x128xf32>
        %87 = arith.addf %84, %86 : vector<16x128xf32>
        %c0_62 = arith.constant 0 : index
        %c0_63 = arith.constant 0 : index
        %88 = vector.load %arg13[%c0_62, %c0_63] : memref<16x128xf32, #tpu.memory_space<vmem>>, vector<16x128xf32>
        tpu.vector_store %arg13[%c0_62, %c0_63], %87 {strides = array<i32>} : memref<16x128xf32, #tpu.memory_space<vmem>>, vector<16x128xf32>,
      } else {
      }
    } else {
    }
    return
  }
  func.func @transform_0(%arg0: i32, %arg1: i32, %arg2: i32) -> (i32, i32) {
    %c0_i32 = arith.constant 0 : i32
    %c0_i32_0 = arith.constant 0 : i32
    %c0_i32_1 = arith.constant 0 : i32
    return %c0_i32, %c0_i32_0 : i32, i32
  }
  func.func @transform_1(%arg0: i32, %arg1: i32, %arg2: i32) -> (i32, i32) {
    %c0_i32 = arith.constant 0 : i32
    return %arg1, %arg2 : i32, i32
  }
  func.func @transform_2(%arg0: i32, %arg1: i32, %arg2: i32) -> (i32, i32) {
    %c0_i32 = arith.constant 0 : i32
    %c0_i32_0 = arith.constant 0 : i32
    return %c0_i32, %arg1 : i32, i32
  }
  func.func @transform_3(%arg0: i32, %arg1: i32, %arg2: i32) -> (i32, i32, i32) {
    %c0_i32 = arith.constant 0 : i32
    %c0_i32_0 = arith.constant 0 : i32
    %c0_i32_1 = arith.constant 0 : i32
    return %arg0, %c0_i32, %c0_i32_0 : i32, i32, i32
  }
  func.func @transform_4(%arg0: i32, %arg1: i32, %arg2: i32) -> (i32, i32, i32) {
    %c0_i32 = arith.constant 0 : i32
    %c0_i32_0 = arith.constant 0 : i32
    %c0_i32_1 = arith.constant 0 : i32
    return %arg0, %c0_i32, %c0_i32_0 : i32, i32, i32
  }
  func.func @transform_5(%arg0: i32, %arg1: i32, %arg2: i32) -> (i32, i32, i32) {
    %c0_i32 = arith.constant 0 : i32
    %c0_i32_0 = arith.constant 0 : i32
    %c0_i32_1 = arith.constant 0 : i32
    return %arg0, %c0_i32, %c0_i32_0 : i32, i32, i32
  }
  func.func @transform_6(%arg0: i32, %arg1: i32, %arg2: i32) -> (i32, i32, i32) {
    %c0_i32 = arith.constant 0 : i32
    %c0_i32_0 = arith.constant 0 : i32
    %c0_i32_1 = arith.constant 0 : i32
    return %arg0, %c0_i32, %c0_i32_0 : i32, i32, i32
  }
  func.func @transform_7(%arg0: i32, %arg1: i32, %arg2: i32) -> (i32, i32, i32) {
    %c0_i32 = arith.constant 0 : i32
    %c0_i32_0 = arith.constant 0 : i32
    %c0_i32_1 = arith.constant 0 : i32
    return %arg0, %c0_i32, %c0_i32_0 : i32, i32, i32
  }
  func.func @transform_8(%arg0: i32, %arg1: i32, %arg2: i32) -> (i32, i32) {
    %c0_i32 = arith.constant 0 : i32
    %c0_i32_0 = arith.constant 0 : i32
    %c0_i32_1 = arith.constant 0 : i32
    return %c0_i32, %c0_i32_0 : i32, i32
  }
  func.func @transform_9(%arg0: i32, %arg1: i32, %arg2: i32) -> (i32, i32) {
    %c0_i32 = arith.constant 0 : i32
    %c0_i32_0 = arith.constant 0 : i32
    %c0_i32_1 = arith.constant 0 : i32
    return %c0_i32, %c0_i32_0 : i32, i32
  }
  func.func @transform_10(%arg0: i32, %arg1: i32, %arg2: i32) -> (i32, i32) {
    %c0_i32 = arith.constant 0 : i32
    %c0_i32_0 = arith.constant 0 : i32
    %c0_i32_1 = arith.constant 0 : i32
    return %c0_i32, %c0_i32_0 : i32, i32
  }
}

</mosaic_0001>

<bundles_post_ra>
// kernel: mygnn_forward.1
= control target key start
LH: loop header
LB: loop body
LE: loop exit
PB: predicated region body
PF: predicated region fallthrough
CT: control target
= control target key end

     0   :  { %s1695_s13 = smov 0   ;;  %s1697_s14 = smov 0   ;;  %s2238_s0 = inlined_call_operand.vmem [shape: f32[128,64], index: 0, kind: input, shape index: {}]   ;;  %s2239_s1 = inlined_call_operand.vmem [shape: bf16[128,128], index: 1, kind: input, shape index: {}]   ;;  %s2240_s2 = inlined_call_operand.vmem [shape: bf16[16,128], index: 2, kind: input, shape index: {}]   ;;  %s2241_s3 = inlined_call_operand.vmem [shape: f32[5,64,64], index: 3, kind: input, shape index: {}]   ;;  %s2242_s4 = inlined_call_operand.vmem [shape: f32[5,1,64], index: 4, kind: input, shape index: {}]   ;;  %s2243_s5 = inlined_call_operand.vmem [shape: f32[5,64,64], index: 5, kind: input, shape index: {}]   ;;  %s2244_s6 = inlined_call_operand.vmem [shape: f32[5,1,64], index: 6, kind: input, shape index: {}]   ;;  %s2245_s7 = inlined_call_operand.vmem [shape: f32[5,64,128], index: 7, kind: input, shape index: {}]   ;;  %s2246_s8 = inlined_call_operand.vmem [shape: f32[64,128], index: 8, kind: input, shape index: {}]   ;;  %s2247_s9 = inlined_call_operand.vmem [shape: f32[1,128], index: 9, kind: input, shape index: {}]   ;;  %s2248_s10 = inlined_call_operand.vmem [shape: f32[16,128], index: 10, kind: output, shape index: {}]  }
   0x1   :  { %s1699_s15 = smov 0  }
   0x2 LB: > { %2250 = sst [smem:[#allocation5_spill]] %s1633_s14  ;;  %s39_s16 = sadd.s32 1, %s1633_s14  ;;  %s1637_s15 = sphi %s1699_s15, %s20_s15   ;;  %s1633_s14 = sphi %s1697_s14, %s2255_s14   ;;  %s1629_s13 = sphi %s1695_s13, %s2254_s13  }
   0x3   : > { %p1461_p0 = scmp.ge.s32.totalorder %s1637_s15, 1  ;;  %p41_p1 = scmp.ge.s32.totalorder %s39_s16, 5 }
   0x4   : > { %p387_p2 = scmp.lt.s32.totalorder %s1637_s15, 6 }
   0x5   : > { %s2257_s16 = smov (%p41_p1, %s39_s16), 0 }
   0x6   : > { %2251 = sst [smem:[#allocation6_spill]] %s2257_s16  ;;  %p388_p3 = pnand %p1461_p0, %p387_p2 }
   0x7   : > { %p461_p4 = scmp.lt.s32.totalorder (!%p388_p3), %s1629_s13, 4  ;;  %s483_s17 = ssub.s32 (!%p388_p3), 0, %s1629_s13 }
   0x8   : > { %391 = sbr.rel (%p388_p3) target bundleno = 1231 (0x4cf), region = 60  ;;  %p495_p5 = scmp.eq.s32.totalorder (!%p388_p3), %s1629_s13, 0 }
   0x9   : > { %p482_p6 = scmp.lt.s32.totalorder (!%p388_p3), %s1629_s13, 0  ;;  %s1468_s19 = smin.u32 (!%p388_p3), %s1629_s13, %s483_s17 }
   0xa   : > { %s485_s21 = sand.u32 (!%p388_p3), 1, %s1468_s19  }
   0xb   : > { %s486_s22 = ssub.s32 (!%p388_p3), 0, %s485_s21 }
   0xd   : > { %s1719_s18 = scalar_select %p461_p4, %s1629_s13, 4  ;;  %v504_v0 = vld [vmem:[%s2238_s0] sm:$0xff] (%p495_p5)  ;;  %vm520_vm0 = vcmask (%p495_p5), 523264   ;;  %v505_v1 = vld [vmem:[%s2238_s0 + $0x8] sm:$0xff] (%p495_p5)  ;;  %v506_v2 = vld [vmem:[%s2238_s0 + $0x10] sm:$0xff] (%p495_p5) }
   0xe   : > { %s2259_s22 = smov (!%p482_p6, %s486_s22), %s485_s21  ;;  %521 = vst.msk [vmem:[#allocation4] sm:$0xff] (%p495_p5), %vm520_vm0, %v504_v0  ;;  %v507_v3 = vld [vmem:[%s2238_s0 + $0x18] sm:$0xff] (%p495_p5)  ;;  %v508_v4 = vld [vmem:[%s2238_s0 + $0x20] sm:$0xff] (%p495_p5)  ;;  %v509_v5 = vld [vmem:[%s2238_s0 + $0x28] sm:$0xff] (%p495_p5) }
   0xf   : > { %s1546_s20 = sshll.u32 %s1719_s18, 6  ;;  %s468_s23 = scalar_lea.vmem %s2242_s4, %s1719_s18  ;;  %522 = vst.msk [vmem:[#allocation4 + $0x8] sm:$0xff] (%p495_p5), %vm520_vm0, %v505_v1  ;;  %v510_v6 = vld [vmem:[%s2238_s0 + $0x30] sm:$0xff] (%p495_p5)  ;;  %v511_v7 = vld [vmem:[%s2238_s0 + $0x38] sm:$0xff] (%p495_p5)  ;;  %v512_v8 = vld [vmem:[%s2238_s0 + $0x40] sm:$0xff] (%p495_p5) }
  0x10   : > { %s1731_s26 = scalar_lea.vmem %s2241_s3, %s1546_s20  ;;  %s1736_s29 = scalar_lea.vmem %s2243_s5, %s1546_s20  ;;  %523 = vst.msk [vmem:[#allocation4 + $0x10] sm:$0xff] (%p495_p5), %vm520_vm0, %v506_v2  ;;  %v513_v9 = vld [vmem:[%s2238_s0 + $0x48] sm:$0xff] (%p495_p5)  ;;  %v514_v10 = vld [vmem:[%s2238_s0 + $0x50] sm:$0xff] (%p495_p5)  ;;  %v515_v11 = vld [vmem:[%s2238_s0 + $0x58] sm:$0xff] (%p495_p5) }
  0x11   : > { %s476_s12 = scalar_lea.vmem %s2244_s6, %s1719_s18  ;;  %s1745_s14 = scalar_lea.vmem %s2245_s7, %s1546_s20  ;;  %524 = vst.msk [vmem:[#allocation4 + $0x18] sm:$0xff] (%p495_p5), %vm520_vm0, %v507_v3  ;;  %v516_v12 = vld [vmem:[%s2238_s0 + $0x60] sm:$0xff] (%p495_p5)  ;;  %v517_v13 = vld [vmem:[%s2238_s0 + $0x68] sm:$0xff] (%p495_p5)  ;;  %v518_v14 = vld [vmem:[%s2238_s0 + $0x70] sm:$0xff] (%p495_p5) }
  0x12   : > { %p1470_p7 = scmp.lt.s32.totalorder %s2259_s22, 0  ;;  %s492_s24 = sadd.s32 2, %s2259_s22  ;;  %525 = vst.msk [vmem:[#allocation4 + $0x20] sm:$0xff] (%p495_p5), %vm520_vm0, %v508_v4  ;;  %v519_v15 = vld [vmem:[%s2238_s0 + $0x78] sm:$0xff] (%p495_p5)  ;;  %v1612_v16 = vld [vmem:[%s2247_s9] ss:$0 sm:$0xff] (%p495_p5) }
  0x13   : > { %503 = sbr.rel (!%p495_p5) target bundleno = 32 (0x20), region = 64  ;;  %526 = vst.msk [vmem:[#allocation4 + $0x28] sm:$0xff] (%p495_p5), %vm520_vm0, %v509_v5 }
  0x14   : > { %s2261_s24 = smov (!%p1470_p7, %s492_s24), %s2259_s22  ;;  %527 = vst.msk [vmem:[#allocation4 + $0x30] sm:$0xff] (%p495_p5), %vm520_vm0, %v510_v6 }
  0x15   : > { %p494_p8 = scmp.eq.s32.totalorder %s2261_s24, 0  ;;  %528 = vst.msk [vmem:[#allocation4 + $0x38] sm:$0xff] (%p495_p5), %vm520_vm0, %v511_v7 }
  0x16   : > { %529 = vst.msk [vmem:[#allocation4 + $0x40] sm:$0xff] (%p495_p5), %vm520_vm0, %v512_v8 }
  0x17   : > { %530 = vst.msk [vmem:[#allocation4 + $0x48] sm:$0xff] (%p495_p5), %vm520_vm0, %v513_v9 }
  0x18   : > { %531 = vst.msk [vmem:[#allocation4 + $0x50] sm:$0xff] %vm520_vm0, %v514_v10 }
  0x19   : > { %532 = vst.msk [vmem:[#allocation4 + $0x58] sm:$0xff] %vm520_vm0, %v515_v11 }
  0x1a   : > { %533 = vst.msk [vmem:[#allocation4 + $0x60] sm:$0xff] %vm520_vm0, %v516_v12 }
  0x1b   : > { %534 = vst.msk [vmem:[#allocation4 + $0x68] sm:$0xff] %vm520_vm0, %v517_v13 }
  0x1c   : > { %535 = vst.msk [vmem:[#allocation4 + $0x70] sm:$0xff] %vm520_vm0, %v518_v14 }
  0x1d   : > { %536 = vst.msk [vmem:[#allocation4 + $0x78] sm:$0xff] %vm520_vm0, %v519_v15 }
  0x1e   : > { %541 = vst [vmem:[%s2248_s10] sm:$0xff] %v1612_v16 }
  0x1f   : > { %542 = vst [vmem:[%s2248_s10 + $0x8] sm:$0xff] %v1612_v16 }
  0x20 PF: > { %v596_v19 = vld [vmem:[#allocation3 + $0x70] sm:$0xff]  ;;  %s598_s28 = scalar_select %p494_p8, 1, 0  ;;  %v597_v20 = vld [vmem:[#allocation3 + $0x78] sm:$0xff]  ;;  %v594_v24 = vld [vmem:[#allocation3 + $0x60] sm:$0xff]  ;;  %vm546_vm2 = vcmask 523264  }
  0x21   : > { %v577_v21 = vld [vmem:[#allocation4 + $0x60] sm:$0xff]  ;;  %v595_v25 = vld [vmem:[#allocation3 + $0x68] sm:$0xff]  ;;  %v576_v33 = vld [vmem:[#allocation4 + $0x58] sm:$0xff]  ;;  %p1537_p9 = scmp.ne.s32.totalorder %s2261_s24, 0 }
  0x22   : > { %v578_v22 = vld [vmem:[#allocation4 + $0x68] sm:$0xff]  ;;  %v599_v23 = vstv %s598_s28  ;;  %v592_v34 = vld [vmem:[#allocation3 + $0x50] sm:$0xff]  ;;  %v593_v35 = vld [vmem:[#allocation3 + $0x58] sm:$0xff] }
  0x23   : > { %v579_v17 = vld [vmem:[#allocation4 + $0x70] sm:$0xff]  ;;  %vm1827_vm1 = vcmp.eq.s32.totalorder %v599_v23, 1  ;;  %v590_v41 = vld [vmem:[#allocation3 + $0x40] sm:$0xff]  ;;  %v591_v42 = vld [vmem:[#allocation3 + $0x48] sm:$0xff] }
  0x24   : > { %v580_v18 = vld [vmem:[#allocation4 + $0x78] sm:$0xff]  ;;  %v1833_v27 = vsel %vm1827_vm1, %v579_v17, %v596_v19  ;;  %v1841_v29 = vsel %vm1827_vm1, %v577_v21, %v594_v24  ;;  %v1845_v30 = vsel %vm1827_vm1, %v578_v22, %v595_v25  ;;  %v1857_v38 = vsel %vm1827_vm1, %v576_v33, %v593_v35  ;;  %v571_v46 = vld [vmem:[#allocation4 + $0x30] sm:$0xff]  ;;  %v569_v53 = vld [vmem:[#allocation4 + $0x20] sm:$0xff] }
  0x25   : > { %v1837_v28 = vsel %vm1827_vm1, %v580_v18, %v597_v20  ;;  %v655_v36 = vpack.c.bf16 %v1845_v30, %v1841_v29  ;;  %v573_v39 = vld [vmem:[#allocation4 + $0x40] sm:$0xff]  ;;  %v572_v47 = vld [vmem:[#allocation4 + $0x38] sm:$0xff]  ;;  %v588_v48 = vld [vmem:[#allocation3 + $0x30] sm:$0xff]  ;;  %v1639_v17 = vmov 0.0  }
  0x26   : > { %v656_v32 = vpack.c.bf16 %v1837_v28, %v1833_v27  ;;  %v574_v40 = vld [vmem:[#allocation4 + $0x48] sm:$0xff]  ;;  %v1863_v44 = vsel %vm1827_vm1, %v573_v39, %v590_v41  ;;  %v589_v49 = vld [vmem:[#allocation3 + $0x38] sm:$0xff]  ;;  %v1873_v51 = vsel %vm1827_vm1, %v571_v46, %v588_v48  ;;  %v586_v55 = vld [vmem:[#allocation3 + $0x20] sm:$0xff]  ;;  %547 = vst.msk [vmem:[#allocation2] sm:$0xff] %vm546_vm2, %v1639_v17 }
  0x27   : > { %v575_v31 = vld [vmem:[#allocation4 + $0x50] sm:$0xff]  ;;  %v1867_v45 = vsel %vm1827_vm1, %v574_v40, %v591_v42  ;;  %v1877_v52 = vsel %vm1827_vm1, %v572_v47, %v589_v49  ;;  %v570_v54 = vld [vmem:[#allocation4 + $0x28] sm:$0xff]  ;;  %v1883_v58 = vsel %vm1827_vm1, %v569_v53, %v586_v55  ;;  %v568_v61 = vld [vmem:[#allocation4 + $0x18] sm:$0xff]  ;;  %548 = vst.msk [vmem:[#allocation2 + $0x8] sm:$0xff] %vm546_vm2, %v1639_v17 }
  0x28   : > { %705 = vmatpush.bf16.msra.mxu0 %v656_v32  ;;  %1563 = vmatpush.bf16.msra.mxu3 %v656_v32  ;;  %v1853_v37 = vsel %vm1827_vm1, %v575_v31, %v592_v34  ;;  %v653_v50 = vpack.c.bf16 %v1867_v45, %v1863_v44  ;;  %v587_v56 = vld [vmem:[#allocation3 + $0x28] sm:$0xff]  ;;  %v652_v57 = vpack.c.bf16 %v1877_v52, %v1873_v51  ;;  %v567_v60 = vld [vmem:[#allocation4 + $0x10] sm:$0xff]  ;;  %v585_v63 = vld [vmem:[#allocation3 + $0x18] sm:$0xff] }
  0x29   : > { %v654_v43 = vpack.c.bf16 %v1857_v38, %v1853_v37  ;;  %v1887_v59 = vsel %vm1827_vm1, %v570_v54, %v587_v56  ;;  %v584_v62 = vld [vmem:[#allocation3 + $0x10] sm:$0xff]  ;;  %v1897_v2 = vsel %vm1827_vm1, %v568_v61, %v585_v63  ;;  %v565_v3 = vld [vmem:[#allocation4] sm:$0xff]  ;;  %v566_v4 = vld [vmem:[#allocation4 + $0x8] sm:$0xff]  ;;  %549 = vst.msk [vmem:[#allocation2 + $0x10] sm:$0xff] %vm546_vm2, %v1639_v17 }
  0x2a   : > { %v651_v0 = vpack.c.bf16 %v1887_v59, %v1883_v58  ;;  %v1893_v1 = vsel %vm1827_vm1, %v567_v60, %v584_v62  ;;  %v582_v5 = vld [vmem:[#allocation3] sm:$0xff]  ;;  %v583_v6 = vld [vmem:[#allocation3 + $0x8] sm:$0xff]  ;;  %v1553_v13 = vld [vmem:[%s2239_s1 + $0x10] sm:$0xff]  ;;  %550 = vst.msk [vmem:[#allocation2 + $0x18] sm:$0xff] %vm546_vm2, %v1639_v17 }
  0x2b   : > { %v650_v7 = vpack.c.bf16 %v1897_v2, %v1893_v1  ;;  %v1903_v8 = vsel %vm1827_vm1, %v565_v3, %v582_v5  ;;  %v1907_v9 = vsel %vm1827_vm1, %v566_v4, %v583_v6  ;;  %v1551_v11 = vld [vmem:[%s2239_s1] sm:$0xff]  ;;  %v1552_v12 = vld [vmem:[%s2239_s1 + $0x8] sm:$0xff]  ;;  %v1554_v14 = vld [vmem:[%s2239_s1 + $0x18] sm:$0xff]  ;;  %551 = vst.msk [vmem:[#allocation2 + $0x20] sm:$0xff] %vm546_vm2, %v1639_v17 }
  0x2c   : > { %706 = vmatpush.bf16.msra.mxu0 %v655_v36  ;;  %1564 = vmatpush.bf16.msra.mxu3 %v655_v36  ;;  %v649_v10 = vpack.c.bf16 %v1907_v9, %v1903_v8  ;;  %v1557_v15 = vld [vmem:[%s2239_s1 + $0x30] sm:$0xff]  ;;  %v880_v16 = vld [vmem:[%s1731_s26 + $0x38] sm:$0xff]  ;;  %552 = vst.msk [vmem:[#allocation2 + $0x28] sm:$0xff] %vm546_vm2, %v1639_v17  ;;  %v1555_v18 = vld [vmem:[%s2239_s1 + $0x20] sm:$0xff] }
  0x2d   : > { %941 = vmatpush.msra.mxu1 %v880_v16  ;;  %553 = vst.msk [vmem:[#allocation2 + $0x30] sm:$0xff] %vm546_vm2, %v1639_v17  ;;  %v1558_v19 = vld [vmem:[%s2239_s1 + $0x38] sm:$0xff]  ;;  %v1556_v20 = vld [vmem:[%s2239_s1 + $0x28] sm:$0xff]  ;;  %v879_v21 = vld [vmem:[%s1731_s26 + $0x30] sm:$0xff] }
  0x2e   : > { %554 = vst.msk [vmem:[#allocation2 + $0x38] sm:$0xff] %vm546_vm2, %v1639_v17  ;;  %v878_v22 = vld [vmem:[%s1731_s26 + $0x28] sm:$0xff]  ;;  %v877_v23 = vld [vmem:[%s1731_s26 + $0x20] sm:$0xff]  ;;  %v876_v24 = vld [vmem:[%s1731_s26 + $0x18] sm:$0xff] }
  0x2f   : > { %555 = vst.msk [vmem:[#allocation2 + $0x40] sm:$0xff] %vm546_vm2, %v1639_v17  ;;  %942 = vmatpush.msra.mxu1 %v879_v21  ;;  %v875_v25 = vld [vmem:[%s1731_s26 + $0x10] sm:$0xff]  ;;  %v874_v26 = vld [vmem:[%s1731_s26 + $0x8] sm:$0xff]  ;;  %v873_v31 = vld [vmem:[%s1731_s26] sm:$0xff] }
  0x30   : > { %707 = vmatpush.bf16.msra.mxu0 %v654_v43  ;;  %1565 = vmatpush.bf16.msra.mxu3 %v654_v43  ;;  %556 = vst.msk [vmem:[#allocation2 + $0x48] sm:$0xff] %vm546_vm2, %v1639_v17  ;;  %v617_v32 = vld [vmem:[#allocation2] sm:$0xff]  ;;  %v618_v35 = vld [vmem:[#allocation2 + $0x8] sm:$0xff]  ;;  %v619_v42 = vld [vmem:[#allocation2 + $0x10] sm:$0xff] }
  0x31   : > { %557 = vst.msk [vmem:[#allocation2 + $0x50] sm:$0xff] %vm546_vm2, %v1639_v17  ;;  %943 = vmatpush.msra.mxu1 %v878_v22  ;;  %v620_v49 = vld [vmem:[#allocation2 + $0x18] sm:$0xff] }
  0x32   : > { %558 = vst.msk [vmem:[#allocation2 + $0x58] sm:$0xff] %vm546_vm2, %v1639_v17  ;;  %v621_v56 = vld [vmem:[#allocation2 + $0x20] sm:$0xff] }
  0x33   : > { %559 = vst.msk [vmem:[#allocation2 + $0x60] sm:$0xff] %vm546_vm2, %v1639_v17  ;;  %944 = vmatpush.msra.mxu1 %v877_v23  ;;  %v622_v63 = vld [vmem:[#allocation2 + $0x28] sm:$0xff] }
  0x34   : > { %708 = vmatpush.bf16.msra.mxu0 %v653_v50  ;;  %1566 = vmatpush.bf16.msra.mxu3 %v653_v50  ;;  %560 = vst.msk [vmem:[#allocation2 + $0x68] sm:$0xff] %vm546_vm2, %v1639_v17  ;;  %v623_v6 = vld [vmem:[#allocation2 + $0x30] sm:$0xff] }
  0x35   : > { %561 = vst.msk [vmem:[#allocation2 + $0x70] sm:$0xff] %vm546_vm2, %v1639_v17  ;;  %945 = vmatpush.msra.mxu1 %v876_v24 }
  0x36   : > { %562 = vst.msk [vmem:[#allocation2 + $0x78] sm:$0xff] %vm546_vm2, %v1639_v17  ;;  %v625_v21 = vld [vmem:[#allocation2 + $0x40] sm:$0xff] }
  0x37   : > { %946 = vmatpush.msra.mxu1 %v875_v25 }
  0x38   : > { %709 = vmatpush.bf16.msra.mxu0 %v652_v57  ;;  %1567 = vmatpush.bf16.msra.mxu3 %v652_v57 }
  0x39   : > { %947 = vmatpush.msra.mxu1 %v874_v26 }
  0x3b   : > { %948 = vmatpush.msra.mxu1 %v873_v31  ;;  %v630_v22 = vld [vmem:[#allocation2 + $0x68] sm:$0xff] }
  0x3c   : > { %710 = vmatpush.bf16.msra.mxu0 %v651_v0  ;;  %1568 = vmatpush.bf16.msra.mxu3 %v651_v0 }
  0x40   : > { %711 = vmatpush.bf16.msra.mxu0 %v650_v7  ;;  %1569 = vmatpush.bf16.msra.mxu3 %v650_v7 }
  0x44   : > { %712 = vmatpush.bf16.msra.mxu0 %v649_v10  ;;  %1570 = vmatpush.bf16.msra.mxu3 %v649_v10 }
  0x47   : > { %713 = vmatmul.bf16.vlgmr.msra.gmra.mxu0 %v1551_v11  ;;  %743 = vmatmul.bf16.vlgmr.msra.gmra.mxu3 %v1557_v15 }
  0x57   : > { %718 = vmatmul.bf16.gmra.mxu0 %v1552_v12  ;;  %748 = vmatmul.bf16.gmra.mxu3 %v1558_v19  ;;  %v629_v19 = vld [vmem:[#allocation2 + $0x60] sm:$0xff] }
  0x67   : > { %723 = vmatmul.bf16.gmra.mxu0 %v1553_v13  ;;  %v624_v13 = vld [vmem:[#allocation2 + $0x38] sm:$0xff] }
  0x77   : > { %728 = vmatmul.bf16.gmra.mxu0 %v1554_v14 }
  0x87   : > { %733 = vmatmul.bf16.gmra.mxu0 %v1555_v18 }
  0x97   : > { %738 = vmatmul.bf16.gmra.mxu0 %v1556_v20 }
  0xc4   : > { %v714_v33 = vpop.f32.mrf.mxu0 }
  0xc5   : > { %v754_v34 = vadd.f32 %v714_v33, %v617_v32  ;;  %v626_v33 = vld [vmem:[#allocation2 + $0x48] sm:$0xff] }
  0xc7   : > { %771 = vst.msk [vmem:[#allocation2] sm:$0xff] %vm546_vm2, %v754_v34  ;;  %v631_v34 = vld [vmem:[#allocation2 + $0x70] sm:$0xff] }
  0xca   : > { %v744_v15 = vpop.f32.mrf.mxu3 }
  0xcb   : > { %v766_v20 = vadd.f32 %v744_v15, %v629_v19 }
  0xcc   : > { %v716_v36 = vpop.f32.mrf.mxu0 }
  0xcd   : > { %v755_v39 = vadd.f32 %v716_v36, %v618_v35  ;;  %783 = vst.msk [vmem:[#allocation2 + $0x60] sm:$0xff] %vm546_vm2, %v766_v20  ;;  %v1613_v20 = vld [vmem:[%s468_s23] ss:$0 sm:$0xff] }
  0xce   : > { %v841_v40 = vld [vmem:[#allocation2] sm:$0xff] }
  0xcf   : > { %772 = vst.msk [vmem:[#allocation2 + $0x8] sm:$0xff] %vm546_vm2, %v755_v39  ;;  %v857_v41 = vadd.f32 %v841_v40, %v1903_v8 }
  0xd1   : > { %1505 = vmatmul.msk.f32.vlgmr.msra.gmra.mxu1 %vm546_vm2, %v857_v41 }
  0xd2   : > { %v746_v24 = vpop.f32.mrf.mxu3 }
  0xd3   : > { %v767_v26 = vadd.f32 %v746_v24, %v630_v22 }
  0xd4   : > { %v719_v43 = vpop.f32.mrf.mxu0 }
  0xd5   : > { %v756_v46 = vadd.f32 %v719_v43, %v619_v42  ;;  %784 = vst.msk [vmem:[#allocation2 + $0x68] sm:$0xff] %vm546_vm2, %v767_v26  ;;  %v627_v43 = vld [vmem:[#allocation2 + $0x50] sm:$0xff] }
  0xd6   : > { %v842_v47 = vld [vmem:[#allocation2 + $0x8] sm:$0xff] }
  0xd7   : > { %773 = vst.msk [vmem:[#allocation2 + $0x10] sm:$0xff] %vm546_vm2, %v756_v46  ;;  %v858_v48 = vadd.f32 %v842_v47, %v1907_v9  ;;  %v632_v46 = vld [vmem:[#allocation2 + $0x78] sm:$0xff] }
  0xd9   : > { %1506 = vmatmul.msk.f32.gmra.mxu1 %vm546_vm2, %v858_v48 }
  0xda   : > { %v749_v36 = vpop.f32.mrf.mxu3 }
  0xdb   : > { %v768_v40 = vadd.f32 %v749_v36, %v631_v34 }
  0xdc   : > { %v721_v50 = vpop.f32.mrf.mxu0 }
  0xdd   : > { %v757_v53 = vadd.f32 %v721_v50, %v620_v49  ;;  %785 = vst.msk [vmem:[#allocation2 + $0x70] sm:$0xff] %vm546_vm2, %v768_v40 }
  0xde   : > { %v843_v54 = vld [vmem:[#allocation2 + $0x10] sm:$0xff] }
  0xdf   : > { %774 = vst.msk [vmem:[#allocation2 + $0x18] sm:$0xff] %vm546_vm2, %v757_v53  ;;  %v859_v55 = vadd.f32 %v843_v54, %v1893_v1 }
  0xe1   : > { %1507 = vmatmul.msk.f32.gmra.mxu1 %vm546_vm2, %v859_v55  ;;  %v628_v55 = vld [vmem:[#allocation2 + $0x58] sm:$0xff] }
  0xe2   : > { %v751_v48 = vpop.f32.mrf.mxu3 }
  0xe3   : > { %v769_v50 = vadd.f32 %v751_v48, %v632_v46 }
  0xe4   : > { %v724_v57 = vpop.f32.mrf.mxu0 }
  0xe5   : > { %v758_v60 = vadd.f32 %v724_v57, %v621_v56  ;;  %786 = vst.msk [vmem:[#allocation2 + $0x78] sm:$0xff] %vm546_vm2, %v769_v50 }
  0xe6   : > { %v844_v61 = vld [vmem:[#allocation2 + $0x18] sm:$0xff] }
  0xe7   : > { %775 = vst.msk [vmem:[#allocation2 + $0x20] sm:$0xff] %vm546_vm2, %v758_v60  ;;  %v860_v62 = vadd.f32 %v844_v61, %v1897_v2 }
  0xe9   : > { %1508 = vmatmul.msk.f32.gmra.mxu1 %vm546_vm2, %v860_v62  ;;  %v1021_v62 = vld [vmem:[%s1736_s29 + $0x38] sm:$0xff] }
  0xea   : > { %1082 = vmatpush.msra.mxu2 %v1021_v62 }
  0xec   : > { %v726_v0 = vpop.f32.mrf.mxu0 }
  0xed   : > { %v759_v3 = vadd.f32 %v726_v0, %v622_v63  ;;  %v1020_v63 = vld [vmem:[%s1736_s29 + $0x30] sm:$0xff]  ;;  %v1019_v0 = vld [vmem:[%s1736_s29 + $0x28] sm:$0xff] }
  0xee   : > { %v845_v4 = vld [vmem:[#allocation2 + $0x20] sm:$0xff]  ;;  %1083 = vmatpush.msra.mxu2 %v1020_v63 }
  0xef   : > { %776 = vst.msk [vmem:[#allocation2 + $0x28] sm:$0xff] %vm546_vm2, %v759_v3  ;;  %v861_v5 = vadd.f32 %v845_v4, %v1883_v58 }
  0xf0   : > { %1084 = vmatpush.msra.mxu2 %v1019_v0 }
  0xf1   : > { %1509 = vmatmul.msk.f32.gmra.mxu1 %vm546_vm2, %v861_v5  ;;  %v1018_v5 = vld [vmem:[%s1736_s29 + $0x20] sm:$0xff] }
  0xf2   : > { %1085 = vmatpush.msra.mxu2 %v1018_v5 }
  0xf4   : > { %v729_v7 = vpop.f32.mrf.mxu0 }
  0xf5   : > { %v760_v10 = vadd.f32 %v729_v7, %v623_v6  ;;  %v1017_v6 = vld [vmem:[%s1736_s29 + $0x18] sm:$0xff]  ;;  %v853_v7 = vld [vmem:[#allocation2 + $0x60] sm:$0xff] }
  0xf6   : > { %v846_v11 = vld [vmem:[#allocation2 + $0x28] sm:$0xff]  ;;  %1086 = vmatpush.msra.mxu2 %v1017_v6 }
  0xf7   : > { %777 = vst.msk [vmem:[#allocation2 + $0x30] sm:$0xff] %vm546_vm2, %v760_v10  ;;  %v862_v12 = vadd.f32 %v846_v11, %v1887_v59  ;;  %v869_v10 = vadd.f32 %v853_v7, %v1841_v29  ;;  %v1016_v11 = vld [vmem:[%s1736_s29 + $0x10] sm:$0xff] }
  0xf8   : > { %1087 = vmatpush.msra.mxu2 %v1016_v11 }
  0xf9   : > { %1510 = vmatmul.msk.f32.gmra.mxu1 %vm546_vm2, %v862_v12  ;;  %v1015_v12 = vld [vmem:[%s1736_s29 + $0x8] sm:$0xff] }
  0xfa   : > { %1088 = vmatpush.msra.mxu2 %v1015_v12 }
  0xfc   : > { %v731_v14 = vpop.f32.mrf.mxu0 }
  0xfd   : > { %v761_v16 = vadd.f32 %v731_v14, %v624_v13  ;;  %v1014_v13 = vld [vmem:[%s1736_s29] sm:$0xff]  ;;  %v854_v14 = vld [vmem:[#allocation2 + $0x68] sm:$0xff] }
  0xfe   : > { %v847_v17 = vld [vmem:[#allocation2 + $0x30] sm:$0xff]  ;;  %1089 = vmatpush.msra.mxu2 %v1014_v13  ;;  %v870_v15 = vadd.f32 %v854_v14, %v1845_v30 }
  0xff   : > { %778 = vst.msk [vmem:[#allocation2 + $0x38] sm:$0xff] %vm546_vm2, %v761_v16  ;;  %v863_v18 = vadd.f32 %v847_v17, %v1873_v51  ;;  %v855_v16 = vld [vmem:[#allocation2 + $0x70] sm:$0xff] }
 0x100   : > { %v871_v17 = vadd.f32 %v855_v16, %v1833_v27 }
 0x101   : > { %1511 = vmatmul.msk.f32.gmra.mxu1 %vm546_vm2, %v863_v18  ;;  %v856_v18 = vld [vmem:[#allocation2 + $0x78] sm:$0xff] }
 0x102   : > { %v872_v19 = vadd.f32 %v856_v18, %v1837_v28 }
 0x104   : > { %v734_v23 = vpop.f32.mrf.mxu0 }
 0x105   : > { %v762_v25 = vadd.f32 %v734_v23, %v625_v21 }
 0x106   : > { %v848_v31 = vld [vmem:[#allocation2 + $0x38] sm:$0xff] }
 0x107   : > { %779 = vst.msk [vmem:[#allocation2 + $0x40] sm:$0xff] %vm546_vm2, %v762_v25  ;;  %v864_v32 = vadd.f32 %v848_v31, %v1877_v52 }
 0x109   : > { %1512 = vmatmul.msk.f32.gmra.mxu1 %vm546_vm2, %v864_v32 }
 0x10c   : > { %v736_v35 = vpop.f32.mrf.mxu0 }
 0x10d   : > { %v763_v39 = vadd.f32 %v736_v35, %v626_v33 }
 0x10e   : > { %v849_v41 = vld [vmem:[#allocation2 + $0x40] sm:$0xff] }
 0x10f   : > { %780 = vst.msk [vmem:[#allocation2 + $0x48] sm:$0xff] %vm546_vm2, %v763_v39  ;;  %v865_v42 = vadd.f32 %v849_v41, %v1863_v44 }
 0x111   : > { %1513 = vmatmul.msk.f32.gmra.mxu1 %vm546_vm2, %v865_v42 }
 0x114   : > { %v739_v47 = vpop.f32.mrf.mxu0 }
 0x115   : > { %v764_v49 = vadd.f32 %v739_v47, %v627_v43 }
 0x116   : > { %v850_v53 = vld [vmem:[#allocation2 + $0x48] sm:$0xff] }
 0x117   : > { %781 = vst.msk [vmem:[#allocation2 + $0x50] sm:$0xff] %vm546_vm2, %v764_v49  ;;  %v866_v54 = vadd.f32 %v850_v53, %v1867_v45 }
 0x119   : > { %1514 = vmatmul.msk.f32.gmra.mxu1 %vm546_vm2, %v866_v54 }
 0x11c   : > { %v741_v56 = vpop.f32.mrf.mxu0 }
 0x11d   : > { %v765_v57 = vadd.f32 %v741_v56, %v628_v55 }
 0x11e   : > { %v851_v60 = vld [vmem:[#allocation2 + $0x50] sm:$0xff] }
 0x11f   : > { %782 = vst.msk [vmem:[#allocation2 + $0x58] sm:$0xff] %vm546_vm2, %v765_v57  ;;  %v867_v61 = vadd.f32 %v851_v60, %v1853_v37 }
 0x121   : > { %1515 = vmatmul.msk.f32.gmra.mxu1 %vm546_vm2, %v867_v61 }
 0x126   : > { %v852_v3 = vld [vmem:[#allocation2 + $0x58] sm:$0xff] }
 0x127   : > { %v868_v4 = vadd.f32 %v852_v3, %v1857_v38 }
 0x129   : > { %1516 = vmatmul.msk.f32.gmra.mxu1 %vm546_vm2, %v868_v4 }
 0x131   : > { %1517 = vmatmul.msk.f32.gmra.mxu1 %vm546_vm2, %v869_v10 }
 0x139   : > { %1518 = vmatmul.msk.f32.gmra.mxu1 %vm546_vm2, %v870_v15 }
 0x141   : > { %1519 = vmatmul.msk.f32.gmra.mxu1 %vm546_vm2, %v871_v17 }
 0x149   : > { %1520 = vmatmul.msk.f32.gmra.mxu1 %vm546_vm2, %v872_v19 }
 0x14e   : > { %v950_v21 = vpop.f32.mrf.mxu1 }
 0x14f   : > { %v951_v22 = vadd.f32 %v1613_v20, %v950_v21 }
 0x151   : > { %v998_v23 = vmax.f32 %v951_v22, 0.0  ;;  %v1614_v22 = vld [vmem:[%s476_s12] ss:$0 sm:$0xff] }
 0x153   : > { %1521 = vmatmul.msk.f32.vlgmr.msra.gmra.mxu2 %vm546_vm2, %v998_v23 }
 0x156   : > { %v953_v24 = vpop.f32.mrf.mxu1 }
 0x157   : > { %v954_v25 = vadd.f32 %v1613_v20, %v953_v24 }
 0x159   : > { %v999_v26 = vmax.f32 %v954_v25, 0.0 }
 0x15b   : > { %1522 = vmatmul.msk.f32.gmra.mxu2 %vm546_vm2, %v999_v26 }
 0x15e   : > { %v956_v31 = vpop.f32.mrf.mxu1 }
 0x15f   : > { %v957_v32 = vadd.f32 %v1613_v20, %v956_v31 }
 0x161   : > { %v1000_v33 = vmax.f32 %v957_v32, 0.0 }
 0x163   : > { %1523 = vmatmul.msk.f32.gmra.mxu2 %vm546_vm2, %v1000_v33 }
 0x166   : > { %v959_v34 = vpop.f32.mrf.mxu1 }
 0x167   : > { %v960_v35 = vadd.f32 %v1613_v20, %v959_v34 }
 0x169   : > { %v1001_v36 = vmax.f32 %v960_v35, 0.0 }
 0x16b   : > { %1524 = vmatmul.msk.f32.gmra.mxu2 %vm546_vm2, %v1001_v36 }
 0x16e   : > { %v962_v39 = vpop.f32.mrf.mxu1 }
 0x16f   : > { %v963_v40 = vadd.f32 %v1613_v20, %v962_v39 }
 0x171   : > { %v1002_v41 = vmax.f32 %v963_v40, 0.0 }
 0x173   : > { %1525 = vmatmul.msk.f32.gmra.mxu2 %vm546_vm2, %v1002_v41 }
 0x176   : > { %v965_v42 = vpop.f32.mrf.mxu1 }
 0x177   : > { %v966_v43 = vadd.f32 %v1613_v20, %v965_v42 }
 0x179   : > { %v1003_v46 = vmax.f32 %v966_v43, 0.0 }
 0x17b   : > { %1526 = vmatmul.msk.f32.gmra.mxu2 %vm546_vm2, %v1003_v46 }
 0x17e   : > { %v968_v47 = vpop.f32.mrf.mxu1 }
 0x17f   : > { %v969_v48 = vadd.f32 %v1613_v20, %v968_v47 }
 0x181   : > { %v1004_v49 = vmax.f32 %v969_v48, 0.0 }
 0x183   : > { %1527 = vmatmul.msk.f32.gmra.mxu2 %vm546_vm2, %v1004_v49 }
 0x186   : > { %v971_v50 = vpop.f32.mrf.mxu1 }
 0x187   : > { %v972_v53 = vadd.f32 %v1613_v20, %v971_v50 }
 0x189   : > { %v1005_v54 = vmax.f32 %v972_v53, 0.0 }
 0x18b   : > { %1528 = vmatmul.msk.f32.gmra.mxu2 %vm546_vm2, %v1005_v54 }
 0x18e   : > { %v974_v55 = vpop.f32.mrf.mxu1 }
 0x18f   : > { %v975_v56 = vadd.f32 %v1613_v20, %v974_v55 }
 0x191   : > { %v1006_v57 = vmax.f32 %v975_v56, 0.0 }
 0x193   : > { %1529 = vmatmul.msk.f32.gmra.mxu2 %vm546_vm2, %v1006_v57 }
 0x196   : > { %v977_v60 = vpop.f32.mrf.mxu1 }
 0x197   : > { %v978_v61 = vadd.f32 %v1613_v20, %v977_v60 }
 0x199   : > { %v1007_v62 = vmax.f32 %v978_v61, 0.0 }
 0x19b   : > { %1530 = vmatmul.msk.f32.gmra.mxu2 %vm546_vm2, %v1007_v62 }
 0x19e   : > { %v980_v63 = vpop.f32.mrf.mxu1 }
 0x19f   : > { %v981_v0 = vadd.f32 %v1613_v20, %v980_v63 }
 0x1a1   : > { %v1008_v3 = vmax.f32 %v981_v0, 0.0 }
 0x1a3   : > { %1531 = vmatmul.msk.f32.gmra.mxu2 %vm546_vm2, %v1008_v3 }
 0x1a6   : > { %v983_v4 = vpop.f32.mrf.mxu1 }
 0x1a7   : > { %v984_v5 = vadd.f32 %v1613_v20, %v983_v4 }
 0x1a9   : > { %v1009_v6 = vmax.f32 %v984_v5, 0.0 }
 0x1ab   : > { %1532 = vmatmul.msk.f32.gmra.mxu2 %vm546_vm2, %v1009_v6 }
 0x1ae   : > { %v986_v7 = vpop.f32.mrf.mxu1 }
 0x1af   : > { %v987_v10 = vadd.f32 %v1613_v20, %v986_v7 }
 0x1b1   : > { %v1010_v11 = vmax.f32 %v987_v10, 0.0 }
 0x1b3   : > { %1533 = vmatmul.msk.f32.gmra.mxu2 %vm546_vm2, %v1010_v11 }
 0x1b6   : > { %v989_v12 = vpop.f32.mrf.mxu1 }
 0x1b7   : > { %v990_v13 = vadd.f32 %v1613_v20, %v989_v12 }
 0x1b9   : > { %v1011_v14 = vmax.f32 %v990_v13, 0.0 }
 0x1bb   : > { %1534 = vmatmul.msk.f32.gmra.mxu2 %vm546_vm2, %v1011_v14 }
 0x1be   : > { %v992_v15 = vpop.f32.mrf.mxu1 }
 0x1bf   : > { %v993_v16 = vadd.f32 %v1613_v20, %v992_v15 }
 0x1c1   : > { %v1012_v17 = vmax.f32 %v993_v16, 0.0 }
 0x1c3   : > { %1535 = vmatmul.msk.f32.gmra.mxu2 %vm546_vm2, %v1012_v17 }
 0x1c6   : > { %v995_v18 = vpop.f32.mrf.mxu1 }
 0x1c7   : > { %v996_v19 = vadd.f32 %v1613_v20, %v995_v18 }
 0x1c9   : > { %v1013_v21 = vmax.f32 %v996_v19, 0.0 }
 0x1cb   : > { %1536 = vmatmul.msk.f32.gmra.mxu2 %vm546_vm2, %v1013_v21 }
 0x1d6   : > { %v1091_v23 = vpop.f32.mrf.mxu2 }
 0x1d7   : > { %v1092_v24 = vadd.f32 %v1614_v22, %v1091_v23 }
 0x1d9   : > { %v2041_v25 = vmax.f32 %v1092_v24, 0.0 }
 0x1de   : > { %v1094_v26 = vpop.f32.mrf.mxu2 }
 0x1df   : > { %v1095_v31 = vadd.f32 %v1614_v22, %v1094_v26 }
 0x1e1   : > { %v2043_v32 = vmax.f32 %v1095_v31, 0.0 }
 0x1e6   : > { %v1097_v33 = vpop.f32.mrf.mxu2 }
 0x1e7   : > { %v1098_v34 = vadd.f32 %v1614_v22, %v1097_v33 }
 0x1e9   : > { %v2045_v35 = vmax.f32 %v1098_v34, 0.0 }
 0x1ee   : > { %v1100_v20 = vpop.f32.mrf.mxu2 }
 0x1ef   : > { %v1101_v36 = vadd.f32 %v1614_v22, %v1100_v20 }
 0x1f1   : > { %v2047_v39 = vmax.f32 %v1101_v36, 0.0 }
 0x1f6   : > { %v1103_v40 = vpop.f32.mrf.mxu2 }
 0x1f7   : > { %v1104_v41 = vadd.f32 %v1614_v22, %v1103_v40 }
 0x1f9   : > { %v2049_v42 = vmax.f32 %v1104_v41, 0.0 }
 0x1fe   : > { %v1106_v43 = vpop.f32.mrf.mxu2 }
 0x1ff   : > { %v1107_v46 = vadd.f32 %v1614_v22, %v1106_v43 }
 0x201   : > { %v2051_v47 = vmax.f32 %v1107_v46, 0.0 }
 0x206   : > { %v1109_v48 = vpop.f32.mrf.mxu2 }
 0x207   : > { %v1110_v49 = vadd.f32 %v1614_v22, %v1109_v48 }
 0x209   : > { %v2053_v50 = vmax.f32 %v1110_v49, 0.0 }
 0x20e   : > { %v1112_v53 = vpop.f32.mrf.mxu2 }
 0x20f   : > { %v1113_v54 = vadd.f32 %v1614_v22, %v1112_v53 }
 0x211   : > { %v2055_v55 = vmax.f32 %v1113_v54, 0.0 }
 0x216   : > { %v1115_v56 = vpop.f32.mrf.mxu2 }
 0x217   : > { %v1116_v57 = vadd.f32 %v1614_v22, %v1115_v56 }
 0x219   : > { %v2057_v60 = vmax.f32 %v1116_v57, 0.0 }
 0x21e   : > { %v1118_v61 = vpop.f32.mrf.mxu2 }
 0x21f   : > { %v1119_v62 = vadd.f32 %v1614_v22, %v1118_v61 }
 0x221   : > { %v1148_v63 = vmax.f32 %v1119_v62, 0.0 }
 0x226   : > { %v1121_v0 = vpop.f32.mrf.mxu2 }
 0x227   : > { %v1122_v3 = vadd.f32 %v1614_v22, %v1121_v0 }
 0x229   : > { %v1149_v4 = vmax.f32 %v1122_v3, 0.0 }
 0x22e   : > { %v1124_v5 = vpop.f32.mrf.mxu2 }
 0x22f   : > { %v1125_v6 = vadd.f32 %v1614_v22, %v1124_v5 }
 0x231   : > { %v1150_v7 = vmax.f32 %v1125_v6, 0.0 }
 0x236   : > { %v1127_v10 = vpop.f32.mrf.mxu2 }
 0x237   : > { %v1128_v11 = vadd.f32 %v1614_v22, %v1127_v10 }
 0x239   : > { %v1151_v12 = vmax.f32 %v1128_v11, 0.0 }
 0x23e   : > { %v1130_v13 = vpop.f32.mrf.mxu2 }
 0x23f   : > { %v1131_v14 = vadd.f32 %v1614_v22, %v1130_v13 }
 0x241   : > { %v1152_v15 = vmax.f32 %v1131_v14, 0.0 }
 0x246   : > { %v1133_v16 = vpop.f32.mrf.mxu2 }
 0x247   : > { %v1134_v17 = vadd.f32 %v1614_v22, %v1133_v16 }
 0x249   : > { %v1153_v18 = vmax.f32 %v1134_v17, 0.0 }
 0x24d   : > { %1157 = sbr.rel (%p1537_p9) target bundleno = 610 (0x262), region = 76 }
 0x24e   : > { %v1136_v19 = vpop.f32.mrf.mxu2 }
 0x24f   : > { %v1137_v21 = vadd.f32 %v1614_v22, %v1136_v19 }
 0x251   : > { %v1154_v23 = vmax.f32 %v1137_v21, 0.0 }
 0x252   : > { %1158 = vst.msk [vmem:[#allocation3] sm:$0xff] %vm546_vm2, %v2041_v25 }
 0x253   : > { %1159 = vst.msk [vmem:[#allocation3 + $0x8] sm:$0xff] %vm546_vm2, %v2043_v32 }
 0x254   : > { %1160 = vst.msk [vmem:[#allocation3 + $0x10] sm:$0xff] %vm546_vm2, %v2045_v35 }
 0x255   : > { %1161 = vst.msk [vmem:[#allocation3 + $0x18] sm:$0xff] %vm546_vm2, %v2047_v39 }
 0x256   : > { %1162 = vst.msk [vmem:[#allocation3 + $0x20] sm:$0xff] %vm546_vm2, %v2049_v42 }
 0x257   : > { %1163 = vst.msk [vmem:[#allocation3 + $0x28] sm:$0xff] %vm546_vm2, %v2051_v47 }
 0x258   : > { %1164 = vst.msk [vmem:[#allocation3 + $0x30] sm:$0xff] %vm546_vm2, %v2053_v50 }
 0x259   : > { %1165 = vst.msk [vmem:[#allocation3 + $0x38] sm:$0xff] %vm546_vm2, %v2055_v55 }
 0x25a   : > { %1166 = vst.msk [vmem:[#allocation3 + $0x40] sm:$0xff] %vm546_vm2, %v2057_v60 }
 0x25b   : > { %1167 = vst.msk [vmem:[#allocation3 + $0x48] sm:$0xff] %vm546_vm2, %v1148_v63 }
 0x25c   : > { %1168 = vst.msk [vmem:[#allocation3 + $0x50] sm:$0xff] %vm546_vm2, %v1149_v4 }
 0x25d   : > { %1169 = vst.msk [vmem:[#allocation3 + $0x58] sm:$0xff] %vm546_vm2, %v1150_v7 }
 0x25e   : > { %1170 = vst.msk [vmem:[#allocation3 + $0x60] sm:$0xff] %vm546_vm2, %v1151_v12 }
 0x25f   : > { %1171 = vst.msk [vmem:[#allocation3 + $0x68] sm:$0xff] %vm546_vm2, %v1152_v15 }
 0x260   : > { %1172 = vst.msk [vmem:[#allocation3 + $0x70] sm:$0xff] %vm546_vm2, %v1153_v18 }
 0x261   : > { %1173 = vst.msk [vmem:[#allocation3 + $0x78] sm:$0xff] %vm546_vm2, %v1154_v23 }
 0x262 PF: > { %1177 = sbr.rel (%p494_p8) target bundleno = 631 (0x277), region = 80 }
 0x267   : > { %1178 = vst.msk [vmem:[#allocation4] sm:$0xff] %vm546_vm2, %v2041_v25 }
 0x268   : > { %1179 = vst.msk [vmem:[#allocation4 + $0x8] sm:$0xff] %vm546_vm2, %v2043_v32 }
 0x269   : > { %1180 = vst.msk [vmem:[#allocation4 + $0x10] sm:$0xff] %vm546_vm2, %v2045_v35 }
 0x26a   : > { %1181 = vst.msk [vmem:[#allocation4 + $0x18] sm:$0xff] %vm546_vm2, %v2047_v39 }
 0x26b   : > { %1182 = vst.msk [vmem:[#allocation4 + $0x20] sm:$0xff] %vm546_vm2, %v2049_v42 }
 0x26c   : > { %1183 = vst.msk [vmem:[#allocation4 + $0x28] sm:$0xff] %vm546_vm2, %v2051_v47 }
 0x26d   : > { %1184 = vst.msk [vmem:[#allocation4 + $0x30] sm:$0xff] %vm546_vm2, %v2053_v50 }
 0x26e   : > { %1185 = vst.msk [vmem:[#allocation4 + $0x38] sm:$0xff] %vm546_vm2, %v2055_v55 }
 0x26f   : > { %1186 = vst.msk [vmem:[#allocation4 + $0x40] sm:$0xff] %vm546_vm2, %v2057_v60 }
 0x270   : > { %1187 = vst.msk [vmem:[#allocation4 + $0x48] sm:$0xff] %vm546_vm2, %v1148_v63 }
 0x271   : > { %1188 = vst.msk [vmem:[#allocation4 + $0x50] sm:$0xff] %vm546_vm2, %v1149_v4 }
 0x272   : > { %1189 = vst.msk [vmem:[#allocation4 + $0x58] sm:$0xff] %vm546_vm2, %v1150_v7 }
 0x273   : > { %1190 = vst.msk [vmem:[#allocation4 + $0x60] sm:$0xff] %vm546_vm2, %v1151_v12 }
 0x274   : > { %1191 = vst.msk [vmem:[#allocation4 + $0x68] sm:$0xff] %vm546_vm2, %v1152_v15 }
 0x275   : > { %1192 = vst.msk [vmem:[#allocation4 + $0x70] sm:$0xff] %vm546_vm2, %v1153_v18 }
 0x276   : > { %1193 = vst.msk [vmem:[#allocation4 + $0x78] sm:$0xff] %vm546_vm2, %v1154_v23 }
 0x277 PF: > { %1198 = vmatpush.msrb.mxu3 %v1154_v23  ;;  %v2121_v22 = vld [vmem:[%s2240_s2] sm:$0xff]   ;;  %v1230_v26 = vld [vmem:[%s1745_s14 + $0x38] sm:$0xff]  ;;  %v1229_v31 = vld [vmem:[%s1745_s14 + $0x30] sm:$0xff]  ;;  %p1541_p10 = scmp.ne.s32.totalorder %s1629_s13, 0 }
 0x278   : > { %v1561_v24 = vunpack.c.l.bf16 %v2121_v22  ;;  %v1228_v33 = vld [vmem:[%s1745_s14 + $0x28] sm:$0xff]  ;;  %v1562_v34 = vunpack.c.h.bf16 %v2121_v22  ;;  %v1226_v20 = vld [vmem:[%s1745_s14 + $0x18] sm:$0xff]  ;;  %v1223_v36 = vld [vmem:[%s1745_s14] sm:$0xff] }
 0x279   : > { %1199 = vmatpush.msrb.mxu3 %v1153_v18  ;;  %v1221_v41 = vld [vmem:[%s2248_s10] sm:$0xff]  ;;  %v1222_v46 = vld [vmem:[%s2248_s10 + $0x8] sm:$0xff] }
 0x27b   : > { %1200 = vmatpush.msrb.mxu3 %v1152_v15 }
 0x27d   : > { %1201 = vmatpush.msrb.mxu3 %v1151_v12 }
 0x27f   : > { %1202 = vmatpush.msrb.mxu3 %v1150_v7 }
 0x281   : > { %1203 = vmatpush.msrb.mxu3 %v1149_v4 }
 0x283   : > { %1204 = vmatpush.msrb.mxu3 %v1148_v63 }
 0x285   : > { %1205 = vmatpush.msrb.mxu3 %v2057_v60 }
 0x287   : > { %1206 = vmatpush.msrb.mxu3 %v2055_v55 }
 0x289   : > { %1207 = vmatpush.msrb.mxu3 %v2053_v50 }
 0x28b   : > { %1208 = vmatpush.msrb.mxu3 %v2051_v47 }
 0x28d   : > { %1209 = vmatpush.msrb.mxu3 %v2049_v42 }
 0x28f   : > { %1210 = vmatpush.msrb.mxu3 %v2047_v39 }
 0x291   : > { %1211 = vmatpush.msrb.mxu3 %v2045_v35  ;;  %v1227_v35 = vld [vmem:[%s1745_s14 + $0x20] sm:$0xff] }
 0x293   : > { %1212 = vmatpush.msrb.mxu3 %v2043_v32  ;;  %v1225_v32 = vld [vmem:[%s1745_s14 + $0x10] sm:$0xff] }
 0x295   : > { %1213 = vmatpush.msrb.mxu3 %v2041_v25  ;;  %v1224_v25 = vld [vmem:[%s1745_s14 + $0x8] sm:$0xff] }
 0x296   : > { %1214 = vmatmul.f32.vlgmr.msrb.gmra.mxu3 %v1561_v24 }
 0x297   : > { %1245 = vmatpush.msra.mxu3 %v1230_v26 }
 0x299   : > { %1246 = vmatpush.msra.mxu3 %v1229_v31 }
 0x29b   : > { %1247 = vmatpush.msra.mxu3 %v1228_v33 }
 0x29d   : > { %1248 = vmatpush.msra.mxu3 %v1227_v35 }
 0x29e   : > { %1217 = vmatmul.f32.gmra.mxu3 %v1562_v34 }
 0x29f   : > { %1249 = vmatpush.msra.mxu3 %v1226_v20 }
 0x2a1   : > { %1250 = vmatpush.msra.mxu3 %v1225_v32 }
 0x2a3   : > { %1251 = vmatpush.msra.mxu3 %v1224_v25 }
 0x2a5   : > { %1252 = vmatpush.msra.mxu3 %v1223_v36 }
 0x319   : > { %v1215_v39 = vpop.f32.mrf.mxu3 }
 0x31a   : > { %1539 = vmatmul.msk.f32.vlgmr.msra.gmra.mxu3 %vm546_vm2, %v1215_v39 }
 0x321   : > { %v1218_v40 = vpop.f32.mrf.mxu3 }
 0x322   : > { %1540 = vmatmul.msk.f32.gmra.mxu3 %vm546_vm2, %v1218_v40 }
 0x39d   : > { %v1254_v42 = vpop.f32.mrf.mxu3 }
 0x39e   : > { %v1260_v43 = vadd.f32 %v1254_v42, %v1221_v41 }
 0x3a0   : > { %1262 = vst [vmem:[%s2248_s10] sm:$0xff] %v1260_v43 }
 0x3a4   : > { %1266 = sbr.rel (%p1541_p10) target bundleno = 1231 (0x4cf), region = 84 }
 0x3a5   : > { %v1257_v47 = vpop.f32.mrf.mxu3 }
 0x3a6   : > { %v1261_v48 = vadd.f32 %v1257_v47, %v1222_v46 }
 0x3a8   : > { %1263 = vst [vmem:[%s2248_s10 + $0x8] sm:$0xff] %v1261_v48 }
 0x3a9   : > { %1267 = vmatpush.msra.mxu0 %v1837_v28  ;;  %1571 = vmatpush.msra.mxu2 %v1837_v28  ;;  %v1299_v49 = vld [vmem:[%s2246_s8 + $0x38] sm:$0xff]  ;;  %v1298_v50 = vld [vmem:[%s2246_s8 + $0x30] sm:$0xff]  ;;  %v1297_v53 = vld [vmem:[%s2246_s8 + $0x28] sm:$0xff] }
 0x3aa   : > { %1314 = vmatpush.msra.mxu1 %v1299_v49  ;;  %v1296_v28 = vld [vmem:[%s2246_s8 + $0x20] sm:$0xff] }
 0x3ab   : > { %1268 = vmatpush.msra.mxu0 %v1833_v27  ;;  %1572 = vmatpush.msra.mxu2 %v1833_v27  ;;  %v1295_v27 = vld [vmem:[%s2246_s8 + $0x18] sm:$0xff] }
 0x3ac   : > { %1315 = vmatpush.msra.mxu1 %v1298_v50 }
 0x3ad   : > { %1269 = vmatpush.msra.mxu0 %v1845_v30  ;;  %1573 = vmatpush.msra.mxu2 %v1845_v30  ;;  %v1294_v30 = vld [vmem:[%s2246_s8 + $0x10] sm:$0xff] }
 0x3ae   : > { %1316 = vmatpush.msra.mxu1 %v1297_v53 }
 0x3af   : > { %1270 = vmatpush.msra.mxu0 %v1841_v29  ;;  %1574 = vmatpush.msra.mxu2 %v1841_v29  ;;  %v1293_v29 = vld [vmem:[%s2246_s8 + $0x8] sm:$0xff] }
 0x3b0   : > { %1317 = vmatpush.msra.mxu1 %v1296_v28 }
 0x3b1   : > { %1271 = vmatpush.msra.mxu0 %v1857_v38  ;;  %1575 = vmatpush.msra.mxu2 %v1857_v38 }
 0x3b2   : > { %1318 = vmatpush.msra.mxu1 %v1295_v27 }
 0x3b3   : > { %1272 = vmatpush.msra.mxu0 %v1853_v37  ;;  %1576 = vmatpush.msra.mxu2 %v1853_v37  ;;  %v1292_v37 = vld [vmem:[%s2246_s8] sm:$0xff] }
 0x3b4   : > { %1319 = vmatpush.msra.mxu1 %v1294_v30 }
 0x3b5   : > { %1273 = vmatpush.msra.mxu0 %v1867_v45  ;;  %1577 = vmatpush.msra.mxu2 %v1867_v45  ;;  %v1290_v45 = vld [vmem:[%s2248_s10] sm:$0xff] }
 0x3b6   : > { %1320 = vmatpush.msra.mxu1 %v1293_v29 }
 0x3b7   : > { %1274 = vmatpush.msra.mxu0 %v1863_v44  ;;  %1578 = vmatpush.msra.mxu2 %v1863_v44 }
 0x3b8   : > { %1321 = vmatpush.msra.mxu1 %v1292_v37 }
 0x3b9   : > { %1275 = vmatpush.msra.mxu0 %v1877_v52  ;;  %1579 = vmatpush.msra.mxu2 %v1877_v52 }
 0x3bb   : > { %1276 = vmatpush.msra.mxu0 %v1873_v51  ;;  %1580 = vmatpush.msra.mxu2 %v1873_v51 }
 0x3bd   : > { %1277 = vmatpush.msra.mxu0 %v1887_v59  ;;  %1581 = vmatpush.msra.mxu2 %v1887_v59 }
 0x3bf   : > { %1278 = vmatpush.msra.mxu0 %v1883_v58  ;;  %1582 = vmatpush.msra.mxu2 %v1883_v58  ;;  %v1291_v58 = vld [vmem:[%s2248_s10 + $0x8] sm:$0xff] }
 0x3c1   : > { %1279 = vmatpush.msra.mxu0 %v1897_v2  ;;  %1583 = vmatpush.msra.mxu2 %v1897_v2 }
 0x3c3   : > { %1280 = vmatpush.msra.mxu0 %v1893_v1  ;;  %1584 = vmatpush.msra.mxu2 %v1893_v1 }
 0x3c5   : > { %1281 = vmatpush.msra.mxu0 %v1907_v9  ;;  %1585 = vmatpush.msra.mxu2 %v1907_v9 }
 0x3c7   : > { %1282 = vmatpush.msra.mxu0 %v1903_v8  ;;  %1586 = vmatpush.msra.mxu2 %v1903_v8 }
 0x3c8   : > { %1283 = vmatmul.f32.vlgmr.msra.gmra.mxu0 %v1561_v24  ;;  %1286 = vmatmul.f32.vlgmr.msra.gmra.mxu2 %v1562_v34 }
 0x445   : > { %v1284_v38 = vpop.f32.mrf.mxu0 }
 0x446   : > { %1542 = vmatmul.msk.f32.vlgmr.msra.gmra.mxu1 %vm546_vm2, %v1284_v38 }
 0x44b   : > { %v1287_v44 = vpop.f32.mrf.mxu2 }
 0x44e   : > { %1543 = vmatmul.msk.f32.gmra.mxu1 %vm546_vm2, %v1287_v44 }
 0x4c3   : > { %v1323_v51 = vpop.f32.mrf.mxu1 }
 0x4c4   : > { %v1329_v52 = vadd.f32 %v1323_v51, %v1290_v45 }
 0x4c6   : > { %1331 = vst [vmem:[%s2248_s10] sm:$0xff] %v1329_v52 }
 0x4cb   : > { %v1326_v59 = vpop.f32.mrf.mxu1 }
 0x4cc   : > { %v1330_v1 = vadd.f32 %v1326_v59, %v1291_v58 }
 0x4ce   : > { %1332 = vst [vmem:[%s2248_s10 + $0x8] sm:$0xff] %v1330_v1 }
 0x4cf PF: > { %s20_s15 = sadd.s32 1, %s1637_s15   ;;  %s2254_s13 = sld [smem:[#allocation5_spill]] }
 0x4d0   : > { %p17_p11 = scmp.ge.s32.totalorder %s20_s15, 7   ;;  %s2255_s14 = sld [smem:[#allocation6_spill]] }
 0x4d2   :  { %19 = sbr.rel (!%p17_p11) target bundleno = 2 (0x2), region = 132 }

</bundles_post_ra>
